<compile_context>
chip_gen: v7x
topology: tpu7x:2x2x1
jax: 0.10.0
libtpu: 0.0.40
codegen_flags: <defaults>
</compile_context>

<pallas_src>
import functools

import jax
import jax.numpy as jnp
from jax.experimental import pallas as pl
from jax.experimental.pallas import tpu as pltpu


def _round_up(n, m):
    return ((n + m - 1) // m) * m


def _centerloss_kernel(x_ref, lab_ref, c_ref, o_ref, acc_ref, *, batch, tb):
    i = pl.program_id(0)

    @pl.when(i == 0)
    def _init():
        acc_ref[...] = jnp.zeros_like(acc_ref)

    c = c_ref[...]                                   # (C, D), resident across grid
    labels = lab_ref[...]                            # (TB, 1) int32
    num_classes = c.shape[0]

    # Gather each sample's center row via one_hot @ centers on the MXU.
    classes = jax.lax.broadcasted_iota(jnp.int32, (tb, num_classes), 1)
    one_hot = (classes == labels).astype(c.dtype)    # (TB, C)
    c_sel = jax.lax.dot_general(
        one_hot, c,
        dimension_numbers=(((1,), (0,)), ((), ())),  # native (M,K)x(K,N), no transpose
        preferred_element_type=jnp.float32,
    )                                                # (TB, D) f32

    # ||x - c||^2 per row, in f32.
    diff = x_ref[...].astype(jnp.float32) - c_sel
    sq = jnp.sum(diff * diff, axis=1, keepdims=True)        # (TB, 1)
    clamped = jnp.clip(sq, 1e-12, 1e12)

    # Mask rows that are batch padding (only relevant in the last tile).
    row = i * tb + jax.lax.broadcasted_iota(jnp.int32, (tb, 1), 0)
    contrib = jnp.where(row < batch, clamped, 0.0)

    acc_ref[...] += jnp.sum(contrib, axis=0, keepdims=True)  # (1, 1)

    @pl.when(i == pl.num_programs(0) - 1)
    def _finalize():
        o_ref[...] = acc_ref[...] * jnp.float32(1.0 / batch)


def center_loss(x, centers, labels, *, block_b=128):
    """x: (B, D) float, centers: (C, D) float, labels: (B,) int -> () float32."""
    B, D = x.shape
    C, Dc = centers.shape
    assert D == Dc

    # Batch tile: multiple of 8 sublanes, capped at block_b.
    tb = _round_up(min(block_b, _round_up(B, 8)), 8)
    bp = _round_up(B, tb)
    if bp != B:
        x = jnp.pad(x, ((0, bp - B), (0, 0)))
        labels = jnp.pad(labels, (0, bp - B))
    labels2d = labels.astype(jnp.int32).reshape(bp, 1)

    grid = (bp // tb,)
    kernel = functools.partial(_centerloss_kernel, batch=B, tb=tb)

    out = pl.pallas_call(
        kernel,
        out_shape=jax.ShapeDtypeStruct((1, 1), jnp.float32),
        grid_spec=pltpu.PrefetchScalarGridSpec(
            num_scalar_prefetch=0,
            grid=grid,
            in_specs=[
                pl.BlockSpec((tb, D), lambda i: (i, 0)),   # x tile (double-buffered)
                pl.BlockSpec((tb, 1), lambda i: (i, 0)),   # labels tile
                pl.BlockSpec((C, D), lambda i: (0, 0)),    # centers resident once
            ],
            out_specs=pl.BlockSpec((1, 1), lambda i: (0, 0)),
            scratch_shapes=[pltpu.VMEM((1, 1), jnp.float32)],
        ),
        compiler_params=pltpu.CompilerParams(
            # The batch grid axis is a reduction into the (1,1) accumulator,
            # so it must be "arbitrary". (To exploit v7x's two TensorCores,
            # emit per-tile partials instead and reduce outside the kernel.)
            dimension_semantics=("arbitrary",),
            vmem_limit_bytes=32 * 1024 * 1024,
        ),
    )(x, labels2d, centers)
    return out[0, 0]


def xavier_uniform(key, num_classes, feat_dim):
    # matches nn.init.xavier_uniform_ for a (num_classes, feat_dim) matrix
    bound = jnp.sqrt(6.0 / (num_classes + feat_dim))
    return jax.random.uniform(
        key, (num_classes, feat_dim), dtype=jnp.float32,
        minval=-bound, maxval=bound,
    )


if __name__ == "__main__":
    num_classes = 16
    feat_dim = 32
    batch = 20  # not a multiple of the block size -> exercises pad-row masking

    key = jax.random.PRNGKey(0)
    k_c, k_x, k_l = jax.random.split(key, 3)

    centers = xavier_uniform(k_c, num_classes, feat_dim)
    x = jax.random.normal(k_x, (batch, feat_dim), dtype=jnp.float32)
    labels = jax.random.randint(k_l, (batch,), 0, num_classes, dtype=jnp.int32)

    # block_b=8 -> grid of 3 tiles, last tile has 4 padded rows (masked).
    loss = center_loss(x, centers, labels, block_b=8)
    loss = jax.block_until_ready(loss)

    # pure-JAX reference sanity check
    diff = x - centers[labels]
    ref = jnp.mean(jnp.clip(jnp.sum(diff * diff, axis=1), 1e-12, 1e12))
    assert jnp.allclose(loss, ref, rtol=1e-5, atol=1e-6), (loss, ref)

    print("KERNEL_OK")
</pallas_src>

<mosaic_0001>
module attributes {stable_mosaic.version = 11 : i64} {
  func.func @_centerloss_kernel(%arg0: i32, %arg1: memref<8x32xf32, #tpu.memory_space<vmem>>, %arg2: memref<8x1xi32, #tpu.memory_space<vmem>>, %arg3: memref<16x32xf32, #tpu.memory_space<vmem>>, %arg4: memref<1x1xf32, #tpu.memory_space<vmem>>, %arg5: memref<1x1xf32, #tpu.memory_space<vmem>>) attributes {dimension_semantics = [#tpu.dimension_semantics<arbitrary>], iteration_bounds = array<i64: 3>, scalar_prefetch = 0 : i64, scratch_operands = 1 : i64, tpu.core_type = #tpu.core_type<tc>, window_params = [{transform_indices = @transform_0, window_bounds = array<i64: 8, 32>}, {transform_indices = @transform_1, window_bounds = array<i64: 8, 1>}, {pipeline_mode = #tpu.pipeline_mode<synchronous>, transform_indices = @transform_2, window_bounds = array<i64: 16, 32>}, {pipeline_mode = #tpu.pipeline_mode<synchronous>, transform_indices = @transform_3, window_bounds = array<i64: 1, 1>}]} {
    %c0_i32 = arith.constant 0 : i32
    %0 = arith.cmpi eq, %arg0, %c0_i32 : i32
    %1 = arith.extui %0 : i1 to i32
    %c0_i32_0 = arith.constant 0 : i32
    %2 = arith.cmpi ne, %1, %c0_i32_0 : i32
    scf.if %2 {
      %cst_16 = arith.constant 0.000000e+00 : f32
      %36 = vector.broadcast %cst_16 : f32 to vector<1x1xf32>
      %c0_17 = arith.constant 0 : index
      %c0_18 = arith.constant 0 : index
      %37 = vector.load %arg5[%c0_17, %c0_18] : memref<1x1xf32, #tpu.memory_space<vmem>>, vector<1x1xf32>
      tpu.vector_store %arg5[%c0_17, %c0_18], %36 {strides = array<i32>} : memref<1x1xf32, #tpu.memory_space<vmem>>, vector<1x1xf32>,
    } else {
    }
    %c0 = arith.constant 0 : index
    %c0_1 = arith.constant 0 : index
    %3 = vector.load %arg3[%c0, %c0_1] : memref<16x32xf32, #tpu.memory_space<vmem>>, vector<16x32xf32>
    %c0_2 = arith.constant 0 : index
    %c0_3 = arith.constant 0 : index
    %4 = vector.load %arg2[%c0_2, %c0_3] : memref<8x1xi32, #tpu.memory_space<vmem>>, vector<8x1xi32>
    %5 = tpu.iota {dimensions = array<i32: 1>} : vector<8x16xi32>
    %6 = vector.broadcast %4 : vector<8x1xi32> to vector<8x16xi32>
    %7 = arith.cmpi eq, %5, %6 : vector<8x16xi32>
    %8 = arith.extui %7 : vector<8x16xi1> to vector<8x16xi32>
    %9 = arith.sitofp %8 : vector<8x16xi32> to vector<8x16xf32>
    %cst = arith.constant dense<0.000000e+00> : vector<8x32xf32>
    %10 = tpu.matmul %9, %3, %cst {dimension_numbers = #tpu.dot_dimension_numbers<[1], [0], [0], [1], [0, 0, 1, 1], [], []>} : vector<8x16xf32>, vector<16x32xf32>, vector<8x32xf32> -> vector<8x32xf32>
    %c0_4 = arith.constant 0 : index
    %c0_5 = arith.constant 0 : index
    %11 = vector.load %arg1[%c0_4, %c0_5] : memref<8x32xf32, #tpu.memory_space<vmem>>, vector<8x32xf32>
    %12 = arith.subf %11, %10 : vector<8x32xf32>
    %13 = arith.mulf %12, %12 : vector<8x32xf32>
    %cst_6 = arith.constant dense<0.000000e+00> : vector<8xf32>
    %14 = vector.multi_reduction <add>, %13, %cst_6 [1] : vector<8x32xf32> to vector<8xf32>
    %15 = vector.shape_cast %14 : vector<8xf32> to vector<8x1xf32>
    %cst_7 = arith.constant 9.99999996E-13 : f32
    %cst_8 = arith.constant 9.99999995E+11 : f32
    %16 = vector.broadcast %cst_7 : f32 to vector<8x1xf32>
    %17 = arith.maximumf %16, %15 : vector<8x1xf32>
    %18 = vector.broadcast %cst_8 : f32 to vector<8x1xf32>
    %19 = arith.minimumf %18, %17 : vector<8x1xf32>
    %c8_i32 = arith.constant 8 : i32
    %20 = arith.muli %arg0, %c8_i32 : i32
    %21 = tpu.iota {dimensions = array<i32: 0>} : vector<8x1xi32>
    %22 = vector.broadcast %20 : i32 to vector<8x1xi32>
    %23 = arith.addi %22, %21 : vector<8x1xi32>
    %c20_i32 = arith.constant 20 : i32
    %24 = vector.broadcast %c20_i32 : i32 to vector<8x1xi32>
    %25 = arith.cmpi slt, %23, %24 : vector<8x1xi32>
    %cst_9 = arith.constant 0.000000e+00 : f32
    %26 = vector.broadcast %cst_9 : f32 to vector<8x1xf32>
    %27 = arith.select %25, %19, %26 : vector<8x1xi1>, vector<8x1xf32>
    %c0_10 = arith.constant 0 : index
    %c0_11 = arith.constant 0 : index
    %28 = vector.load %arg5[%c0_10, %c0_11] : memref<1x1xf32, #tpu.memory_space<vmem>>, vector<1x1xf32>
    %cst_12 = arith.constant dense<0.000000e+00> : vector<1xf32>
    %29 = vector.multi_reduction <add>, %27, %cst_12 [0] : vector<8x1xf32> to vector<1xf32>
    %30 = vector.shape_cast %29 : vector<1xf32> to vector<1x1xf32>
    %31 = arith.addf %28, %30 : vector<1x1xf32>
    %c0_13 = arith.constant 0 : index
    %c0_14 = arith.constant 0 : index
    %32 = vector.load %arg5[%c0_13, %c0_14] : memref<1x1xf32, #tpu.memory_space<vmem>>, vector<1x1xf32>
    tpu.vector_store %arg5[%c0_13, %c0_14], %31 {strides = array<i32>} : memref<1x1xf32, #tpu.memory_space<vmem>>, vector<1x1xf32>,
    %c2_i32 = arith.constant 2 : i32
    %33 = arith.cmpi eq, %arg0, %c2_i32 : i32
    %34 = arith.extui %33 : i1 to i32
    %c0_i32_15 = arith.constant 0 : i32
    %35 = arith.cmpi ne, %34, %c0_i32_15 : i32
    scf.if %35 {
      %c0_16 = arith.constant 0 : index
      %c0_17 = arith.constant 0 : index
      %36 = vector.load %arg5[%c0_16, %c0_17] : memref<1x1xf32, #tpu.memory_space<vmem>>, vector<1x1xf32>
      %cst_18 = arith.constant 5.000000e-02 : f32
      %37 = vector.broadcast %cst_18 : f32 to vector<1x1xf32>
      %38 = arith.mulf %36, %37 : vector<1x1xf32>
      %c0_19 = arith.constant 0 : index
      %c0_20 = arith.constant 0 : index
      %39 = vector.load %arg4[%c0_19, %c0_20] : memref<1x1xf32, #tpu.memory_space<vmem>>, vector<1x1xf32>
      tpu.vector_store %arg4[%c0_19, %c0_20], %38 {strides = array<i32>} : memref<1x1xf32, #tpu.memory_space<vmem>>, vector<1x1xf32>,
    } else {
    }
    return
  }
  func.func @transform_0(%arg0: i32) -> (i32, i32) {
    %c0_i32 = arith.constant 0 : i32
    %c0_i32_0 = arith.constant 0 : i32
    return %arg0, %c0_i32 : i32, i32
  }
  func.func @transform_1(%arg0: i32) -> (i32, i32) {
    %c0_i32 = arith.constant 0 : i32
    %c0_i32_0 = arith.constant 0 : i32
    return %arg0, %c0_i32 : i32, i32
  }
  func.func @transform_2(%arg0: i32) -> (i32, i32) {
    %c0_i32 = arith.constant 0 : i32
    %c0_i32_0 = arith.constant 0 : i32
    %c0_i32_1 = arith.constant 0 : i32
    return %c0_i32, %c0_i32_0 : i32, i32
  }
  func.func @transform_3(%arg0: i32) -> (i32, i32) {
    %c0_i32 = arith.constant 0 : i32
    %c0_i32_0 = arith.constant 0 : i32
    %c0_i32_1 = arith.constant 0 : i32
    return %c0_i32, %c0_i32_0 : i32, i32
  }
}

</mosaic_0001>

<bundles_post_ra>
// kernel: tpu_custom_call.1
= control target key start
LH: loop header
LB: loop body
LE: loop exit
PB: predicated region body
PF: predicated region fallthrough
CT: control target
= control target key end

     0   :  { %8 = vsyncpa [#allocation4], 0  ;;  %s627_s0 = inlined_call_operand.vmem [shape: f32[24,32], index: 0, kind: input, shape index: {}]   ;;  %s628_s1 = inlined_call_operand.vmem [shape: s32[24,1], index: 1, kind: input, shape index: {}]   ;;  %s629_s2 = inlined_call_operand.hbm [shape: f32[16,32], index: 2, kind: input, shape index: {}]   ;;  %s630_s3 = inlined_call_operand.hbm [shape: f32[1,1], index: 3, kind: output, shape index: {}]  }
   0x1   :  { %9 = vsyncpa [#allocation5], 0  ;;  %s543_s12 = smov 0  }
   0x2 LB: > { %s549_s13 = sadd.s32 4294967295, %s512_s12   ;;  %p381_p0 = scmp.ge.s32.totalorder %s512_s12, 1  ;;  %s512_s12 = sphi %s543_s12, %s15_s12  }
   0x3   : > { %p114_p1 = scmp.lt.s32.totalorder %s512_s12, 4  ;;  %s514_s14 = smov [#allocation3]  }
   0x4   : > { %s126_s15 = sshll.u32 %s514_s14, 4  ;;  %p631_p4 = scmp.eq.s32.totalorder %s549_s13, 0  ;;  %s127_s15 = int_to_ptr.vmem [resolvable:$true] %s126_s15 }
   0x5   : > { %p554_p3 = pnand %p381_p0, %p114_p1  ;;  %s444_s20 = scalar_lea.hbm %s629_s2, 256 }
   0x6   : > { %p445_p7 = scmp.ne.s32.totalorder %s629_s2, %s444_s20  ;;  %p451_p11 = scmp.lt.u32.totalorder %s444_s20, %s629_s2 }
   0x7   : > { %s633_s16 = scalar_select %p554_p3, 1, 0 }
   0x8   : > { %p418_p5 = pneg %p554_p3 }
   0xa   : > { %p563_p6 = pnand %p631_p4, %p418_p5 }
   0xc   : > { %p446_p8 = pneg %p563_p6 }
   0xe   : > { %p447_p9 = pnand %p446_p8, %p445_p7 }
  0x10   : > { %p448_p10 = pneg %p447_p9 }
  0x12   : > { %p453_p12 = pnand %p451_p11, %p448_p10 }
  0x14   : > { %456 = shalt.err (!%p453_p12)
}
  0x15   : > { %s457_s25 = scalar_lea.vmem %s127_s15, 256  ;;  %p465_p5 = scmp.lt.s32.totalorder %s127_s15, %s127_s15 }
  0x16   : > { %p458_p13 = scmp.ne.s32.totalorder %s127_s15, %s457_s25  ;;  %p466_p2 = scmp.lt.s32.totalorder %s457_s25, %s457_s25 }
  0x18   : > { %p460_p0 = pnand %p458_p13, %p446_p8  ;;  %p467_p4 = por %p466_p2, %p465_p5 }
  0x1a   : > { %p461_p1 = pneg %p460_p0 }
  0x1c   : > { %p468_p3 = pnand %p467_p4, %p461_p1 }
  0x1e   : > { %471 = shalt.err (!%p468_p3)
}
  0x1f   : > { %s515_s26 = smov 128   ;;  %s516_s27 = smov 8  }
  0x20   : > { %421 = dma.hbm_to_vmem [thread:$0]  (!%p563_p6), %s629_s2, 256, %s127_s15, [#allocation4], %s515_s26, %s515_s26, %s516_s27  }
  0x21   : > { %p635_p7 = scmp.ne.s32.totalorder %s633_s16, 0 }
  0x22   : > { %p636_p9 = scmp.eq.s32.totalorder (!%p635_p7), %s549_s13, 0 }
  0x23   : > { %156 = sbr.rel (%p635_p7) target bundleno = 599 (0x257), region = 32 }
  0x2a   : > { %503 = dma.done.wait (%p636_p9), [#allocation4], 256   ;;  %p637_p8 = pmov %p636_p9 }
  0x2b   : > { %p178_p2 = scmp.lt.s32.totalorder %s549_s13, 2  ;;  %p638_p3 = scmp.ne.s32.totalorder %s549_s13, 0 }
  0x2c   : > { %505 = vsyncadd (%p637_p8), [#allocation4], 4294967040  ;;  %vm190_vm0 = vcmask (!%p638_p3), 0   ;;  %v517_v0 = vmov (!%p638_p3), 0.0  }
  0x2d   : > { %s179_s30 = scalar_select %p178_p2, %s549_s13, 2 }
  0x2e   : > { %189 = sbr.rel (%p638_p3) target bundleno = 53 (0x35), region = 40  ;;  %191 = vst.msk [vmem:[#allocation2] sm:$0x1] (!%p638_p3), %vm190_vm0, %v517_v0 }
  0x2f   : > { %s386_s4 = sshll.u32 %s179_s30, 3 }
  0x30   : > { %s181_s7 = scalar_lea.vmem %s627_s0, %s386_s4  ;;  %s185_s10 = scalar_lea.vmem %s628_s1, %s386_s4 }
  0x35 PF: > { %v194_v1 = vld [vmem:[%s185_s10] sm:$0xff]  ;;  %v193_v3 = vld [vmem:[#allocation3 + $0x8] sm:$0xff]  ;;  %v518_v4 = vmov 0   ;;  %v519_v5 = vmov 0.0|0.0   ;;  %vm520_vm1 = vmmov 0   ;;  %v521_v7 = vmov 0.0  }
  0x36   : > { %v192_v2 = vld [vmem:[#allocation3] sm:$0xff]  ;;  %443 = vset.pattern.permute.xlu0 %v518_v4  ;;  %407 = vmatprep.subr.bf16.mxu0 %v519_v5  ;;  %v195_v8 = vlaneseq  ;;  %vm203_vm2 = vcmask 130048   ;;  %vm280_vm4 = vcmask 261120   ;;  %s391_s11 = sshll.u32 %s549_s13, 3  ;;  %v293_v30 = vld [vmem:[#allocation2] sm:$0x1] }
  0x37   : > { %v408_v6 = vpack.c.bf16 %v193_v3, %v192_v2  ;;  %198 = vperm.xlu0 %443, %v194_v1   ;;  %404 = vmatprep.mubr.msk.f32.mxu0 %vm520_vm1, %v521_v7  ;;  %v277_v12 = vld [vmem:[%s181_s7] sm:$0xff]  ;;  %v289_v19 = vstv %s391_s11  ;;  %vm301_vm6 = vcmask 0   ;;  %p392_p4 = scmp.ne.s32.totalorder %s549_s13, 2 }
  0x38   : > { %v196_v9 = vand.u32 127, %v195_v8  ;;  %v288_v18 = vshrl.u32 %v195_v8, 7 }
  0x39   : > { %409 = vmatpush3.bf16.msra.mxu0 %v408_v6 }
  0x3a   : > { %v290_v20 = vadd.s32 %v289_v19, %v288_v18 }
  0x3c   : > { %vm291_vm5 = vcmp.lt.s32.totalorder %v290_v20, 20 }
  0xb6   : > { %v199_v10 = vpop.permute.xlu0 %198 }
  0xb7   : > { %vm200_vm3 = vcmp.eq.s32.totalorder %v196_v9, %v199_v10 }
  0xb8   : > { %v389_v11 = vsel %vm200_vm3, 1.0, %v521_v7 }
  0xb9   : > { %405 = vmatmul.mubr.msk.f32.vlgmr.msra.gmra.mrb[0].mxu0 %vm203_vm2, %v389_v11 }
 0x18c   : > { %v273_v13 = vpop.f32.mrb[0].mxu0 }
 0x18d   : > { %v278_v14 = vsub.f32 %v277_v12, %v273_v13  ;;  %v406_v15 = vpop.f32.mrb[1].mxu0 }
 0x18f   : > { %v279_v16 = vmul.f32 %v278_v14, %v278_v14 }
 0x191   : > { %v281_v17 = vsel %vm280_vm4, %v279_v16, 0.0 }
 0x192   : > { %282 = vadd.xlane.f32.xlu0 %v281_v17 }
 0x21f   : > { %v283_v21 = vpop.xlane.xlu0 %282 }
 0x220   : > { %v284_v22 = vmax.f32 %v283_v21, 1e-12 }
 0x222   : > { %v285_v23 = vmin.f32 %v284_v22, 1e+12 }
 0x224   : > { %v292_v24 = vsel %vm291_vm5, %v285_v23, 0.0 }
 0x225   : > { %v294_v25 = vrot.slane %v292_v24, 4 }
 0x227   : > { %v295_v26 = vadd.f32 %v294_v25, %v292_v24 }
 0x229   : > { %v296_v27 = vrot.slane %v295_v26, 2 }
 0x22b   : > { %v297_v28 = vadd.f32 %v296_v27, %v295_v26 }
 0x22d   : > { %v298_v29 = vrot.slane %v297_v28, 1  ;;  %306 = sbr.rel (%p392_p4) target bundleno = 574 (0x23e), region = 44 }
 0x22f   : > { %v299_v31 = vadd.f32 %v298_v29, %v297_v28 }
 0x231   : > { %v300_v32 = vadd.f32 %v299_v31, %v293_v30 }
 0x233   : > { %302 = vst.msk [vmem:[#allocation2] sm:$0x1] %vm301_vm6, %v300_v32 }
 0x23a   : > { %v307_v33 = vld [vmem:[#allocation2] sm:$0x1] }
 0x23b   : > { %v308_v34 = vmul.f32 0.05, %v307_v33 }
 0x23d   : > { %309 = vst.msk [vmem:[#allocation6] sm:$0x1] %vm301_vm6, %v308_v34 }
 0x23e PF: > { %p424_p6 = scmp.eq.s32.totalorder %s549_s13, 2  ;;  %s522_s14 = smov [#allocation6]  }
 0x23f   : > { %s317_s15 = sshll.u32 %s522_s14, 4  ;;  %s318_s15 = int_to_ptr.vmem [resolvable:$true] %s317_s15 }
 0x240   : > { %s472_s16 = scalar_lea.vmem %s318_s15, 16  ;;  %s478_s17 = scalar_lea.vmem %s318_s15, 32 }
 0x241   : > { %p473_p10 = scmp.ne.s32.totalorder %s318_s15, %s472_s16  ;;  %p479_p13 = scmp.lt.s32.totalorder %s318_s15, %s318_s15 }
 0x242   : > { %p480_p0 = scmp.lt.s32.totalorder %s478_s17, %s472_s16 }
 0x243   : > { %p474_p11 = pnand %p473_p10, %p424_p6 }
 0x244   : > { %p481_p1 = por %p480_p0, %p479_p13 }
 0x245   : > { %p475_p12 = pneg %p474_p11 }
 0x247   : > { %p482_p5 = pnand %p481_p1, %p475_p12 }
 0x249   : > { %485 = shalt.err (!%p482_p5)
}
 0x24a   : > { %s486_s20 = scalar_lea.hbm %s630_s3, 16 }
 0x24b   : > { %p487_p7 = scmp.ne.s32.totalorder %s630_s3, %s486_s20  ;;  %p492_p2 = scmp.lt.u32.totalorder %s486_s20, %s630_s3 }
 0x24d   : > { %p488_p9 = pnand %p487_p7, %p424_p6 }
 0x24f   : > { %p489_p8 = pneg %p488_p9 }
 0x251   : > { %p494_p3 = pnand %p492_p2, %p489_p8 }
 0x253   : > { %497 = shalt.err (!%p494_p3)
}
 0x254   : > { %415 = dma.vmem_to_hbm [thread:$0]  (%p424_p6), %s318_s15, 16, %s630_s3, [#allocation5]  }
 0x255   : > { %507 = dma.done.wait (%p424_p6), [#allocation5], 16  }
 0x256   : > { %509 = vsyncadd (%p424_p6), [#allocation5], 4294967280 }
 0x257 PF: > { %s15_s12 = sadd.s32 1, %s512_s12  }
 0x258   : > { %p12_p4 = scmp.ge.s32.totalorder %s15_s12, 5  }
 0x25a   :  { %14 = sbr.rel (!%p12_p4) target bundleno = 2 (0x2), region = 75 }
 0x261   :  { %330 = vsyncpa [#allocation4], 1 }
 0x262   :  { %332 = vsyncpa [#allocation4 + $0x1], 1 }
 0x263   :  { %333 = vsyncpa [#allocation5], 1 }
 0x264   :  { %335 = vsyncpa [#allocation5 + $0x1], 1 }

</bundles_post_ra>
